<compile_context>
chip_gen: v6e
topology: v6e:2x2x1
jax: 0.10.0
libtpu: 0.0.40
codegen_flags: <defaults>
</compile_context>

<pallas_src>
import functools

import jax
import jax.numpy as jnp
from jax.experimental import pallas as pl
from jax.experimental.pallas import tpu as pltpu


def _round_up(x, m):
    return ((x + m - 1) // m) * m


def _attn_general_kernel(enc_ref, qt_ref, out_ref, *, n_rows, batch):
    """One grid step of the streaming attention kernel.

    Grid: (num_tiles,), "arbitrary"; out_ref is resident across it.

      enc_ref: (TILE_LB, H)  flattened encoder tile, native dtype; global row
                             r = l*B + b  <->  (sequence pos l, batch b)
      qt_ref:  (H, B) f32    q^T with q[b] = hidden[b] @ W   (grid-constant)
      out_ref: (LBP, B) f32  resident all-pairs score block; overwritten with
                             the attention probabilities on the last step
    """
    li = pl.program_id(0)
    num_t = pl.num_programs(0)
    tile_lb = enc_ref.shape[0]

    # All-pairs scores on the MXU: s[r, b'] = <enc_row_r, q_b'>.
    x = enc_ref[...].astype(jnp.float32)      # upcast after the native-dtype load
    s = jnp.dot(x, qt_ref[...], preferred_element_type=jnp.float32)

    off = li * tile_lb
    if tile_lb % 8 == 0:
        off = pl.multiple_of(off, 8)
    out_ref[pl.ds(off, tile_lb), :] = s

    # Last step: masked softmax over the full, now-complete resident block.
    @pl.when(li == num_t - 1)
    def _softmax():
        lbp, b = out_ref.shape
        rows = jax.lax.broadcasted_iota(jnp.int32, (lbp, b), 0)
        cols = jax.lax.broadcasted_iota(jnp.int32, (lbp, b), 1)
        if (batch & (batch - 1)) == 0:             # power-of-two fast path
            row_b = jnp.bitwise_and(rows, batch - 1)
        else:
            row_b = rows % batch
        # Valid slot: this flattened row belongs to batch column b' AND lies
        # inside the real L*B extent (the tail of the last tile was read past
        # the array and may hold garbage/NaN).  Mask BEFORE max/exp.
        valid = jnp.logical_and(row_b == cols, rows < n_rows)
        e = jnp.where(valid, out_ref[...], -jnp.inf)
        m = jnp.max(e, axis=0, keepdims=True)                     # (1, B)
        p = jnp.exp(e - m)                                        # 0 at invalid slots
        z = jnp.sum(p, axis=0, keepdims=True)                     # (1, B)
        inv = pl.reciprocal(z, approx=True)                       # EUP slot
        inv = inv * (2.0 - z * inv)        # one Newton step -> full f32 accuracy
        # Each row has exactly one non-zero column, so a lane reduction
        # compacts the all-pairs probabilities to one value per (l, b) row.
        probs = jnp.sum(p * inv, axis=-1, keepdims=True)          # (LBP, 1)
        out_ref[...] = jnp.broadcast_to(probs, (lbp, b))


def attn_general(hidden, encoder_outputs, w, b=None, *, tile_rows=None):
    """Forward of Attn(method='general') as a single Pallas TPU kernel.

    hidden:          (1, B, H)
    encoder_outputs: (L, B, H)  native PyTorch layout and native dtype (the
                                kernel streams it as-is; no wrapper-side copy)
    w:               (H, H)     nn.Linear weight (out_features, in_features)
    b:               (H,)       nn.Linear bias; accepted for API parity -- its
                                contribution is constant over the sequence
                                axis and cancels under the softmax.
    tile_rows:       optional override of flattened rows streamed per grid step
    returns:         (B, 1, L)  attention weights (f32)
    """
    L, B, H = encoder_outputs.shape
    N = L * B

    # q[b] = W^T hidden[b]  (row convention: hidden @ W).  Tiny (B*H^2); done
    # in plain XLA so the (H, H) weight never enters kernel VMEM.
    h2 = hidden.reshape(B, H).astype(jnp.float32)
    qt = jnp.dot(h2, w.astype(jnp.float32)).T            # (H, B) f32
    enc_flat = encoder_outputs.reshape(N, H)              # free reshape, native dtype

    # ---- Tile sizing from the real (8,128)-padded VMEM footprint. ----
    itemsize = jnp.dtype(encoder_outputs.dtype).itemsize
    lane_h = _round_up(H, 128)
    lane_b = _round_up(B, 128)
    try:
        vmem_cap = int(pltpu.get_tpu_info().vmem_capacity_bytes)
    except Exception:                                      # non-TPU trace / old runtime
        vmem_cap = 64 * 1024 * 1024                        # assume smallest (v7x/core)
    budget = int(vmem_cap * 0.45)

    res_rows = _round_up(N, 8)
    fixed = (2 * res_rows * lane_b * 4                     # resident out block, 2 bufs
             + 2 * _round_up(H, 8) * lane_b * 4)           # q^T, 2 bufs
    n_buf = 2
    stream_budget = max(budget - fixed, n_buf * 8 * lane_h * itemsize)
    auto_rows = stream_budget // (n_buf * lane_h * itemsize)

    req_rows = int(tile_rows) if tile_rows is not None else int(auto_rows)
    if req_rows >= N:
        tile_lb, num_tiles = N, 1
    else:
        tile_lb = max(8, (req_rows // 8) * 8)
        num_tiles = pl.cdiv(N, tile_lb)
    lbp = num_tiles * tile_lb

    vmem_need = (n_buf * _round_up(tile_lb, 8) * lane_h * itemsize   # enc stream
                 + 2 * lbp * lane_b * 4                              # resident out
                 + 2 * _round_up(H, 8) * lane_b * 4)                 # q^T
    vmem_limit = int(min(vmem_cap * 0.9, max(32 * 1024 * 1024, 2 * vmem_need)))

    # TODO(synk): a leading "parallel" batch-group grid axis (megacore, v7x) and
    # a lane-dense (B, L) output layout would need an in-kernel transpose; they
    # only pay off for large B, so decoder-sized B keeps the simple form.
    out = pl.pallas_call(
        functools.partial(_attn_general_kernel, n_rows=N, batch=B),
        out_shape=jax.ShapeDtypeStruct((lbp, B), jnp.float32),
        grid=(num_tiles,),
        in_specs=[
            pl.BlockSpec((tile_lb, H), lambda i: (i, 0)),   # enc stream (native dtype)
            pl.BlockSpec((H, B), lambda i: (0, 0)),         # q^T (grid-constant)
        ],
        out_specs=pl.BlockSpec((lbp, B), lambda i: (0, 0)),
        compiler_params=pltpu.CompilerParams(
            dimension_semantics=("arbitrary",),     # output block resident across L*B
            vmem_limit_bytes=vmem_limit,
        ),
    )(enc_flat, qt)

    # Row r of the flat output is (l, b) = divmod(r, B); every column of a row
    # holds the same (compacted) probability, so column 0 suffices.  Tiny.
    probs = out[:N, 0].reshape(L, B)
    return jnp.transpose(probs)[:, None, :]


def attn_general_ref(hidden, encoder_outputs, w, b):
    """Literal JAX transcription of the PyTorch forward (incl. the bias term)."""
    enc = encoder_outputs.astype(jnp.float32)
    proj = jnp.einsum('lbh,kh->lbk', enc, w.astype(jnp.float32)) + b.astype(jnp.float32)
    e = jnp.einsum('bh,lbh->bl', hidden[0].astype(jnp.float32), proj)
    return jax.nn.softmax(e, axis=-1)[:, None, :]                  # (B, 1, L)


def _make_inputs(B, L, H, key):
    k1, k2, k3, k4 = jax.random.split(key, 4)
    hidden = jax.random.normal(k1, (1, B, H), dtype=jnp.float32)
    enc = jax.random.normal(k2, (L, B, H), dtype=jnp.float32)
    bound = 1.0 / (H ** 0.5)                 # PyTorch nn.Linear default init
    w = jax.random.uniform(k3, (H, H), minval=-bound, maxval=bound,
                           dtype=jnp.float32)
    bb = jax.random.uniform(k4, (H,), minval=-bound, maxval=bound,
                            dtype=jnp.float32)
    return hidden, enc, w, bb


if __name__ == "__main__":
    attn = jax.jit(attn_general, static_argnames=("tile_rows",))

    # 1) Small shape matching a typical decoder step of the NMT model.
    B, L, H = 2, 8, 32
    hidden, enc, w, b = _make_inputs(B, L, H, jax.random.PRNGKey(0))
    out = jax.block_until_ready(attn(hidden, enc, w, b))
    ref = attn_general_ref(hidden, enc, w, b)
    assert out.shape == (B, 1, L), out.shape
    assert jnp.allclose(out, ref, atol=1e-4, rtol=1e-4), \
        float(jnp.max(jnp.abs(out - ref)))

    # 2) Larger shape exercising the multi-tile stream + garbage-tail masking.
    B2, L2, H2 = 4, 300, 128
    hidden2, enc2, w2, b2 = _make_inputs(B2, L2, H2, jax.random.PRNGKey(1))
    out2 = jax.block_until_ready(attn(hidden2, enc2, w2, b2, tile_rows=512))
    ref2 = attn_general_ref(hidden2, enc2, w2, b2)
    assert out2.shape == (B2, 1, L2), out2.shape
    assert jnp.allclose(out2, ref2, atol=1e-4, rtol=1e-4), \
        float(jnp.max(jnp.abs(out2 - ref2)))

    # 3) Native-dtype streaming path: bf16 encoder outputs are streamed as-is
    #    (half the HBM bytes) and upcast inside the kernel.
    enc2_bf = enc2.astype(jnp.bfloat16)
    out3 = jax.block_until_ready(attn(hidden2, enc2_bf, w2, b2))
    ref3 = attn_general_ref(hidden2, enc2_bf, w2, b2)
    assert out3.shape == (B2, 1, L2), out3.shape
    assert jnp.allclose(out3, ref3, atol=1e-4, rtol=1e-4), \
        float(jnp.max(jnp.abs(out3 - ref3)))

    # TODO(synk): only method='general' is implemented; 'dot' is this kernel
    # with W = I, and 'concat' would need the extra `v` parameter.
    print("KERNEL_OK")
</pallas_src>

<mosaic_0001>
module attributes {stable_mosaic.version = 11 : i64} {
  func.func @_attn_general_kernel(%arg0: i32, %arg1: memref<16x32xf32, #tpu.memory_space<vmem>>, %arg2: memref<32x2xf32, #tpu.memory_space<vmem>>, %arg3: memref<16x2xf32, #tpu.memory_space<vmem>>) attributes {dimension_semantics = [#tpu.dimension_semantics<arbitrary>], iteration_bounds = array<i64: 1>, scalar_prefetch = 0 : i64, scratch_operands = 0 : i64, tpu.core_type = #tpu.core_type<tc>, window_params = [{transform_indices = @transform_0, window_bounds = array<i64: 16, 32>}, {pipeline_mode = #tpu.pipeline_mode<synchronous>, transform_indices = @transform_1, window_bounds = array<i64: 32, 2>}, {pipeline_mode = #tpu.pipeline_mode<synchronous>, transform_indices = @transform_2, window_bounds = array<i64: 16, 2>}]} {
    %c0 = arith.constant 0 : index
    %c0_0 = arith.constant 0 : index
    %0 = vector.load %arg1[%c0, %c0_0] : memref<16x32xf32, #tpu.memory_space<vmem>>, vector<16x32xf32>
    %c0_1 = arith.constant 0 : index
    %c0_2 = arith.constant 0 : index
    %1 = vector.load %arg2[%c0_1, %c0_2] : memref<32x2xf32, #tpu.memory_space<vmem>>, vector<32x2xf32>
    %cst = arith.constant dense<0.000000e+00> : vector<16x2xf32>
    %2 = tpu.matmul %0, %1, %cst {dimension_numbers = #tpu.dot_dimension_numbers<[1], [0], [0], [1], [0, 0, 1, 1], [], []>} : vector<16x32xf32>, vector<32x2xf32>, vector<16x2xf32> -> vector<16x2xf32>
    %c16_i32 = arith.constant 16 : i32
    %3 = arith.muli %arg0, %c16_i32 : i32
    %4 = tpu.assume_multiple %3, 8 : i32
    %5 = arith.index_cast %4 : i32 to index
    %c0_3 = arith.constant 0 : index
    %6 = vector.load %arg3[%5, %c0_3] : memref<16x2xf32, #tpu.memory_space<vmem>>, vector<16x2xf32>
    tpu.vector_store %arg3[%5, %c0_3], %2 {strides = array<i32>} : memref<16x2xf32, #tpu.memory_space<vmem>>, vector<16x2xf32>,
    %c0_i32 = arith.constant 0 : i32
    %7 = arith.cmpi eq, %arg0, %c0_i32 : i32
    %8 = arith.extui %7 : i1 to i32
    %c0_i32_4 = arith.constant 0 : i32
    %9 = arith.cmpi ne, %8, %c0_i32_4 : i32
    scf.if %9 {
      %10 = tpu.iota {dimensions = array<i32: 0>} : vector<16x2xi32>
      %11 = tpu.iota {dimensions = array<i32: 1>} : vector<16x2xi32>
      %c1_i32 = arith.constant 1 : i32
      %12 = vector.broadcast %c1_i32 : i32 to vector<16x2xi32>
      %13 = arith.andi %10, %12 : vector<16x2xi32>
      %14 = arith.cmpi eq, %13, %11 : vector<16x2xi32>
      %c16_i32_5 = arith.constant 16 : i32
      %15 = vector.broadcast %c16_i32_5 : i32 to vector<16x2xi32>
      %16 = arith.cmpi slt, %10, %15 : vector<16x2xi32>
      %17 = arith.andi %14, %16 : vector<16x2xi1>
      %c0_6 = arith.constant 0 : index
      %c0_7 = arith.constant 0 : index
      %18 = vector.load %arg3[%c0_6, %c0_7] : memref<16x2xf32, #tpu.memory_space<vmem>>, vector<16x2xf32>
      %cst_8 = arith.constant 0xFF800000 : f32
      %19 = vector.broadcast %cst_8 : f32 to vector<16x2xf32>
      %20 = arith.select %17, %18, %19 : vector<16x2xi1>, vector<16x2xf32>
      %cst_9 = arith.constant dense<0xFF800000> : vector<2xf32>
      %21 = vector.multi_reduction <maximumf>, %20, %cst_9 [0] : vector<16x2xf32> to vector<2xf32>
      %22 = vector.shape_cast %21 : vector<2xf32> to vector<1x2xf32>
      %23 = vector.broadcast %22 : vector<1x2xf32> to vector<16x2xf32>
      %24 = arith.subf %20, %23 : vector<16x2xf32>
      %25 = math.exp %24 : vector<16x2xf32>
      %cst_10 = arith.constant dense<0.000000e+00> : vector<2xf32>
      %26 = vector.multi_reduction <add>, %25, %cst_10 [0] : vector<16x2xf32> to vector<2xf32>
      %27 = vector.shape_cast %26 : vector<2xf32> to vector<1x2xf32>
      %28 = tpu.reciprocal %27 {approx = true} : vector<1x2xf32> -> vector<1x2xf32>
      %29 = arith.mulf %27, %28 : vector<1x2xf32>
      %cst_11 = arith.constant 2.000000e+00 : f32
      %30 = vector.broadcast %cst_11 : f32 to vector<1x2xf32>
      %31 = arith.subf %30, %29 : vector<1x2xf32>
      %32 = arith.mulf %28, %31 : vector<1x2xf32>
      %33 = vector.broadcast %32 : vector<1x2xf32> to vector<16x2xf32>
      %34 = arith.mulf %25, %33 : vector<16x2xf32>
      %cst_12 = arith.constant dense<0.000000e+00> : vector<16xf32>
      %35 = vector.multi_reduction <add>, %34, %cst_12 [1] : vector<16x2xf32> to vector<16xf32>
      %36 = vector.shape_cast %35 : vector<16xf32> to vector<16x1xf32>
      %37 = vector.shape_cast %36 : vector<16x1xf32> to vector<16x1xf32>
      %38 = vector.broadcast %37 : vector<16x1xf32> to vector<16x2xf32>
      %c0_13 = arith.constant 0 : index
      %c0_14 = arith.constant 0 : index
      %39 = vector.load %arg3[%c0_13, %c0_14] : memref<16x2xf32, #tpu.memory_space<vmem>>, vector<16x2xf32>
      tpu.vector_store %arg3[%c0_13, %c0_14], %38 {strides = array<i32>} : memref<16x2xf32, #tpu.memory_space<vmem>>, vector<16x2xf32>,
    } else {
    }
    return
  }
  func.func @transform_0(%arg0: i32) -> (i32, i32) {
    %c0_i32 = arith.constant 0 : i32
    %c0_i32_0 = arith.constant 0 : i32
    return %arg0, %c0_i32 : i32, i32
  }
  func.func @transform_1(%arg0: i32) -> (i32, i32) {
    %c0_i32 = arith.constant 0 : i32
    %c0_i32_0 = arith.constant 0 : i32
    %c0_i32_1 = arith.constant 0 : i32
    return %c0_i32, %c0_i32_0 : i32, i32
  }
  func.func @transform_2(%arg0: i32) -> (i32, i32) {
    %c0_i32 = arith.constant 0 : i32
    %c0_i32_0 = arith.constant 0 : i32
    %c0_i32_1 = arith.constant 0 : i32
    return %c0_i32, %c0_i32_0 : i32, i32
  }
}

</mosaic_0001>

<bundles_post_ra>
// kernel: squeeze.1
= control target key start
LH: loop header
LB: loop body
LE: loop exit
PB: predicated region body
PF: predicated region fallthrough
CT: control target
= control target key end

     0   :  { %s67_s8 = smov 122   ;;  %vm8_vm0 = vcmask 15360   ;;  %s68_s11 = smov 124   ;;  %s118_s0 = inlined_call_operand.vmem [shape: f32[16], index: 0, kind: input, shape index: {}]   ;;  %s119_s1 = inlined_call_operand.vmem [shape: f32[8,2], index: 1, kind: output, shape index: {}]  }
   0x1   :  { %v5_v0 = vld [vmem:[%s118_s0] sm:$0x1]  ;;  %s66_s0 = smov 126   ;;  %s69_s12 = smov 120  }
   0x2   :  { %6 = vst [vmem:[#allocation0] sm:$0x1] %v5_v0  ;;  %s70_s13 = smov 118   ;;  %s71_s14 = smov 116  }
   0x3   :  { %s72_s15 = smov 114  }
   0x9   :  { %v10_v1 = vld [vmem:[#allocation0] sm:$0x1]  }
   0xa   :  { %v22_v2 = vld [vmem:[#allocation0] sm:$0x1]   ;;  %11 = vrot.lane.b32.xlu0 %v10_v1, %s66_s0 }
   0xb   :  { %23 = vrot.lane.b32.xlu1 %v22_v2, %s67_s8  ;;  %v16_v3 = vld [vmem:[#allocation0] sm:$0x1]  }
   0xc   :  { %v28_v4 = vld [vmem:[#allocation0] sm:$0x1]  }
   0xd   :  { %v7_v5 = vld [vmem:[#allocation0] sm:$0x1]  }
   0xe   :  { %9 = vst.msk [vmem:[%s119_s1] sm:$0x1] %vm8_vm0, %v7_v5   ;;  %17 = vrot.lane.b32.xlu0 %v16_v3, %s68_s11  ;;  %v34_v6 = vld [vmem:[#allocation0] sm:$0x1]  }
   0xf   :  { %29 = vrot.lane.b32.xlu1 %v28_v4, %s69_s12  ;;  %v40_v7 = vld [vmem:[#allocation0] sm:$0x1]  }
  0x10   :  { %v46_v8 = vld [vmem:[#allocation0] sm:$0x1]  }
  0x12   :  { %35 = vrot.lane.b32.xlu0 %v34_v6, %s70_s13 }
  0x13   :  { %41 = vrot.lane.b32.xlu1 %v40_v7, %s71_s14 }
  0x16   :  { %47 = vrot.lane.b32.xlu0 %v46_v8, %s72_s15 }
  0x7c   :  { %v12_v9 = vpop.permute.xlu0 %11  }
  0x7d   :  { %v24_v10 = vpop.permute.xlu1 %23   ;;  %52 = vst.msk [vmem:[%s119_s1 + $0x1] sm:$0x1] %vm8_vm0, %v12_v9  }
  0x7e   :  { %54 = vst.msk [vmem:[%s119_s1 + $0x3] sm:$0x1] %vm8_vm0, %v24_v10  }
  0x80   :  { %v18_v11 = vpop.permute.xlu0 %17  }
  0x81   :  { %v30_v12 = vpop.permute.xlu1 %29   ;;  %53 = vst.msk [vmem:[%s119_s1 + $0x2] sm:$0x1] %vm8_vm0, %v18_v11  }
  0x82   :  { %55 = vst.msk [vmem:[%s119_s1 + $0x4] sm:$0x1] %vm8_vm0, %v30_v12  }
  0x84   :  { %v36_v13 = vpop.permute.xlu0 %35  }
  0x85   :  { %v42_v14 = vpop.permute.xlu1 %41   ;;  %56 = vst.msk [vmem:[%s119_s1 + $0x5] sm:$0x1] %vm8_vm0, %v36_v13  }
  0x86   :  { %57 = vst.msk [vmem:[%s119_s1 + $0x6] sm:$0x1] %vm8_vm0, %v42_v14  }
  0x88   :  { %v48_v15 = vpop.permute.xlu0 %47  }
  0x89   :  { %58 = vst.msk [vmem:[%s119_s1 + $0x7] sm:$0x1] %vm8_vm0, %v48_v15  }

// kernel: attn_general.1
= control target key start
LH: loop header
LB: loop body
LE: loop exit
PB: predicated region body
PF: predicated region fallthrough
CT: control target
= control target key end

     0   :  { %vm17_vm0 = vcmask 261120   ;;  %v108_v6 = vlaneseq  ;;  %vm101_vm1 = vcmask 15360   ;;  %s255_s1 = inlined_call_operand.vmem [shape: f32[32,2], index: 1, kind: input, shape index: {}]   ;;  %s256_s0 = inlined_call_operand.vmem [shape: f32[16,32], index: 0, kind: input, shape index: {}]   ;;  %s257_s2 = inlined_call_operand.vmem [shape: f32[16,2], index: 2, kind: output, shape index: {}]  }
   0x1   :  { %v16_v0 = vld [vmem:[%s255_s1 + $0x18] sm:$0xff]  ;;  %v15_v1 = vld [vmem:[%s255_s1 + $0x10] sm:$0xff]  ;;  %v11_v2 = vld [vmem:[%s256_s0] sm:$0xff] }
   0x2   :  { %175 = vmatprep.subr.mxu0 %v16_v0  ;;  %v14_v3 = vld [vmem:[%s255_s1 + $0x8] sm:$0xff]  ;;  %183 = vmatprep.mubr.msk.f32.mxu0 %vm17_vm0, %v11_v2  ;;  %v13_v4 = vld [vmem:[%s255_s1] sm:$0xff]  ;;  %v109_v7 = vshrl.u32 %v108_v6, 7  ;;  %v112_v10 = vand.u32 127, %v108_v6 }
   0x3   :  { %176 = vmatpush3.msra.mxu0 %v16_v0  ;;  %v12_v5 = vld [vmem:[%s256_s0 + $0x8] sm:$0xff] }
   0x4   :  { %177 = vmatprep.subr.mxu0 %v15_v1  ;;  %v110_v8 = vadd.s32 8, %v109_v7  ;;  %v113_v13 = vand.u32 1, %v109_v7 }
   0x5   :  { %178 = vmatpush3.msra.mxu0 %v15_v1 }
   0x6   :  { %179 = vmatprep.subr.mxu0 %v14_v3  ;;  %v114_v11 = vand.u32 1, %v110_v8  ;;  %vm115_vm3 = vcmp.eq.s32.totalorder %v113_v13, %v112_v10 }
   0x7   :  { %180 = vmatpush3.msra.mxu0 %v14_v3 }
   0x8   :  { %181 = vmatprep.subr.mxu0 %v13_v4  ;;  %vm116_vm2 = vcmp.eq.s32.totalorder %v114_v11, %v112_v10 }
   0x9   :  { %182 = vmatpush3.msra.mxu0 %v13_v4 }
   0xa   :  { %184 = vmatmul.mubr.msk.f32.vlgmr.msra.gmra.mxu0 %vm17_vm0, %v12_v5 }
  0xca   :  { %v185_v9 = vpop.f32.mrf.mxu0 }
  0xcb   :  { %103 = vst.msk [vmem:[%s257_s2 + $0x8] sm:$0xff] %vm101_vm1, %v185_v9 }
  0xcc   :  { %v90_v12 = vpop.f32.mrf.mxu0 }
  0xcd   :  { %102 = vst.msk [vmem:[%s257_s2] sm:$0xff] %vm101_vm1, %v90_v12 }
  0xd2   :  { %v122_v14 = vld [vmem:[%s257_s2 + $0x8] sm:$0xff] }
  0xd3   :  { %v124_v15 = vsel %vm116_vm2, %v122_v14, -inf }
  0xd4   :  { %v121_v16 = vld [vmem:[%s257_s2] sm:$0xff]  ;;  %v126_v19 = vsel %vm101_vm1, %v124_v15, -inf }
  0xd5   :  { %v123_v17 = vsel %vm115_vm3, %v121_v16, -inf }
  0xd6   :  { %v125_v18 = vsel %vm101_vm1, %v123_v17, -inf }
  0xd7   :  { %v127_v20 = vmax.f32 %v125_v18, %v126_v19 }
  0xd9   :  { %v128_v21 = vrot.slane %v127_v20, 4 }
  0xdb   :  { %v129_v22 = vmax.f32 %v127_v20, %v128_v21 }
  0xdd   :  { %v130_v23 = vrot.slane %v129_v22, 2 }
  0xdf   :  { %v131_v24 = vmax.f32 %v129_v22, %v130_v23 }
  0xe1   :  { %v132_v25 = vrot.slane %v131_v24, 1 }
  0xe3   :  { %v133_v26 = vmax.f32 %v131_v24, %v132_v25 }
  0xe5   :  { %v134_v27 = vsub.f32 %v123_v17, %v133_v26  ;;  %v135_v28 = vsub.f32 %v124_v15, %v133_v26 }
  0xe7   :  { %v136_v29 = vmul.f32 1.442695, %v134_v27  ;;  %v138_v30 = vmul.f32 1.442695, %v135_v28 }
  0xe9   :  { %186 = vpow2.f32 %v136_v29 }
  0xea   :  { %188 = vpow2.f32 %v138_v30 }
  0xf6   :  { %v187_v31 = vpop.eup %186 }
  0xf7   :  { %v189_v32 = vpop.eup %188  ;;  %v140_v33 = vsel %vm101_vm1, %v187_v31, 0.0 }
  0xf8   :  { %v141_v34 = vsel %vm101_vm1, %v189_v32, 0.0 }
  0xf9   :  { %v142_v35 = vadd.f32 %v141_v34, %v140_v33 }
  0xfb   :  { %v143_v36 = vrot.slane %v142_v35, 4 }
  0xfd   :  { %v144_v37 = vadd.f32 %v143_v36, %v142_v35 }
  0xff   :  { %v145_v38 = vrot.slane %v144_v37, 2 }
 0x101   :  { %v146_v39 = vadd.f32 %v145_v38, %v144_v37 }
 0x103   :  { %v147_v40 = vrot.slane %v146_v39, 1 }
 0x105   :  { %v148_v41 = vadd.f32 %v147_v40, %v146_v39 }
 0x107   :  { %190 = vrcp.f32 %v148_v41 }
 0x114   :  { %v191_v42 = vpop.eup %190 }
 0x115   :  { %v150_v43 = vmul.f32 %v191_v42, %v148_v41 }
 0x117   :  { %v151_v44 = vsub.f32 2.0, %v150_v43 }
 0x119   :  { %v152_v45 = vmul.f32 %v191_v42, %v151_v44 }
 0x11b   :  { %v153_v46 = vmul.f32 %v187_v31, %v152_v45  ;;  %v154_v48 = vmul.f32 %v189_v32, %v152_v45 }
 0x11d   :  { %v155_v47 = vsel %vm101_vm1, %v153_v46, 0.0  ;;  %v158_v49 = vsel %vm101_vm1, %v154_v48, 0.0 }
 0x11e   :  { %156 = vadd.xlane.f32.xlu0 %v155_v47 }
 0x122   :  { %159 = vadd.xlane.f32.xlu0 %v158_v49 }
 0x1a7   :  { %v157_v50 = vpop.xlane.xlu0 %156 }
 0x1a8   :  { %161 = vst.msk [vmem:[%s257_s2] sm:$0xff] %vm101_vm1, %v157_v50 }
 0x1ab   :  { %v160_v51 = vpop.xlane.xlu0 %159 }
 0x1ac   :  { %162 = vst.msk [vmem:[%s257_s2 + $0x8] sm:$0xff] %vm101_vm1, %v160_v51 }

</bundles_post_ra>
